<compile_context>
chip_gen: v7x
topology: tpu7x:2x2x1
jax: 0.10.0
libtpu: 0.0.40
codegen_flags: <defaults>
</compile_context>

<pallas_src>
import jax
import jax.numpy as jnp
from jax.experimental import pallas as pl
from jax.experimental.pallas import tpu as pltpu

_LANE = 128  # lane width of a vreg


def _round_up(n, m):
    return ((n + m - 1) // m) * m


def _fused_affine_t_kernel(x_ref, wt_ref, bt_ref, o_ref):
    """out.T tile = Wc.T @ x.T tile + bc.T, batch dense on the lane axis.

    x_ref : (3, TB)  transposed input tile (batch on lanes)
    wt_ref: (8, 3)   fused weight, transposed (out-dim on sublanes)
    bt_ref: (8, 1)   fused bias, transposed
    o_ref : (8, TB)  transposed fused output tile (head1 rows 0:4, head2 4:8)
    """
    xt = x_ref[...]          # (3, TB) f32
    wt = wt_ref[...]         # (8, 3)  f32
    bt = bt_ref[...]         # (8, 1)  f32
    # Three outer-product broadcast FMAs on the VPU:
    #   (8,1) lane-replicated weight column  x  (1,TB) sublane-replicated x row.
    # Lane-dense everywhere; no MXU for K=3/N=8, no masked stores.
    out = (wt[:, 0:1] * xt[0:1, :]
           + wt[:, 1:2] * xt[1:2, :]
           + wt[:, 2:3] * xt[2:3, :]
           + bt)                               # single bias broadcast per tile
    o_ref[...] = out.astype(o_ref.dtype)


def multihead_forward(x, params, *, block_cols=32768):
    """x: [batch, 3] float32.  Returns (head1 [batch, 4], head2 [batch, 4])."""
    batch = x.shape[0]

    # ---- Exact algebraic fusion of trunk + both heads into one affine map ----
    wh = jnp.concatenate([params["wh1"], params["wh2"]], axis=1)   # (2, 8)
    bh = jnp.concatenate([params["bh1"], params["bh2"]], axis=1)   # (1, 8)
    wc = params["w"] @ wh                                          # (3, 8)
    bc = params["b"] @ wh + bh                                     # (1, 8)
    wt = wc.T                                                      # (8, 3)
    bt = bc.T                                                      # (8, 1)

    # ---- Transposed, lane-dense layout: batch on the 128-lane axis ----------
    xt = x.T                                                       # (3, batch)

    if batch <= 2 * _LANE:
        # Tiny batch: one tile equal to the full dims (no lane-divisibility
        # requirement, no padding), single grid step.
        tb, padded = batch, batch
    else:
        # >= 2 grid steps so the "parallel" batch axis shards across v7x's two
        # TensorCores; tile capped by the VMEM budget (~128 B per column
        # double-buffered -> block_cols=32768 ~ 4 MiB, within every
        # generation's scoped VMEM default).
        nsteps = max(2, pl.cdiv(batch, block_cols))
        tb = _round_up(pl.cdiv(batch, nsteps), _LANE)     # lane-aligned tile
        padded = _round_up(batch, tb)                     # sub-tile zero tail
        if padded != batch:
            # Fuses with the transpose under jit: x is read once outside the
            # kernel (12 B/row), the zero tail is < one tile.
            xt = jnp.pad(xt, ((0, 0), (0, padded - batch)))

    grid = padded // tb

    out_t = pl.pallas_call(
        _fused_affine_t_kernel,
        out_shape=jax.ShapeDtypeStruct((8, padded), jnp.float32),
        grid=(grid,),
        in_specs=[
            pl.BlockSpec((3, tb), lambda i: (0, i)),   # x.T tile (lane-dense)
            pl.BlockSpec((8, 3), lambda i: (0, 0)),    # fused weight (resident)
            pl.BlockSpec((8, 1), lambda i: (0, 0)),    # fused bias   (resident)
        ],
        out_specs=pl.BlockSpec((8, tb), lambda i: (0, i)),
        compiler_params=pltpu.CompilerParams(
            # Batch axis is embarrassingly parallel -> shards across the two
            # TensorCores on v7x; harmless on v5e / v6e.
            dimension_semantics=("parallel",)),
    )(xt, wt, bt)

    out_t = out_t[:, :batch]
    # Heads are contiguous row groups of the [8, batch] slab.  Returned
    # batch-major only to match the PyTorch module's interface; under jit the
    # transpose fuses with downstream consumers.
    return out_t[:4, :].T, out_t[4:, :].T


def init_params(key):
    """Deterministic synthetic parameters matching the nn.Module shapes.

    PyTorch:  _linear: Linear(3,2) -> W [2,3], b [2]
              _head1:  Linear(2,4) -> W [4,2], b [4]
              _head2:  Linear(2,4) -> W [4,2], b [4]
    Stored here transposed ([in, out]) and biases as [1, out].
    """
    k = jax.random.split(key, 6)
    return {
        "w":   jax.random.normal(k[0], (3, 2), jnp.float32) * 0.5,
        "b":   jax.random.normal(k[1], (1, 2), jnp.float32) * 0.1,
        "wh1": jax.random.normal(k[2], (2, 4), jnp.float32) * 0.5,
        "bh1": jax.random.normal(k[3], (1, 4), jnp.float32) * 0.1,
        "wh2": jax.random.normal(k[4], (2, 4), jnp.float32) * 0.5,
        "bh2": jax.random.normal(k[5], (1, 4), jnp.float32) * 0.1,
    }


def reference_forward(x, params):
    """Pure-JAX reference with the original (unfused) math of the module."""
    feat = x @ params["w"] + params["b"]
    return (feat @ params["wh1"] + params["bh1"],
            feat @ params["wh2"] + params["bh2"])


if __name__ == "__main__":
    key = jax.random.PRNGKey(0)
    kx, kx2, kx3, kp = jax.random.split(key, 4)
    params = init_params(kp)

    fwd = jax.jit(multihead_forward, static_argnames=("block_cols",))

    # Small-shape check (single-tile path).
    batch = 8
    x = jax.random.normal(kx, (batch, 3), jnp.float32)
    out1, out2 = fwd(x, params)
    jax.block_until_ready((out1, out2))
    ref1, ref2 = reference_forward(x, params)
    assert out1.shape == (batch, 4) and out2.shape == (batch, 4)
    assert jnp.allclose(out1, ref1, atol=1e-5, rtol=1e-5)
    assert jnp.allclose(out2, ref2, atol=1e-5, rtol=1e-5)

    # Grid + lane-padding path with a small forced tile.
    batch2 = 272
    x2 = jax.random.normal(kx2, (batch2, 3), jnp.float32)
    o1b, o2b = fwd(x2, params, block_cols=64)
    jax.block_until_ready((o1b, o2b))
    r1b, r2b = reference_forward(x2, params)
    assert o1b.shape == (batch2, 4) and o2b.shape == (batch2, 4)
    assert jnp.allclose(o1b, r1b, atol=1e-5, rtol=1e-5)
    assert jnp.allclose(o2b, r2b, atol=1e-5, rtol=1e-5)

    # Default-config multi-step path (>= 2 grid steps, non-divisible batch).
    batch3 = 1000
    x3 = jax.random.normal(kx3, (batch3, 3), jnp.float32)
    o1c, o2c = fwd(x3, params)
    jax.block_until_ready((o1c, o2c))
    r1c, r2c = reference_forward(x3, params)
    assert jnp.allclose(o1c, r1c, atol=1e-5, rtol=1e-5)
    assert jnp.allclose(o2c, r2c, atol=1e-5, rtol=1e-5)

    print("KERNEL_OK")
</pallas_src>

<mosaic_0001>
module attributes {stable_mosaic.version = 11 : i64} {
  func.func @_fused_affine_t_kernel(%arg0: i32, %arg1: memref<3x8xf32, #tpu.memory_space<vmem>>, %arg2: memref<8x3xf32, #tpu.memory_space<vmem>>, %arg3: memref<8x1xf32, #tpu.memory_space<vmem>>, %arg4: memref<8x8xf32, #tpu.memory_space<vmem>>) attributes {dimension_semantics = [#tpu.dimension_semantics<parallel>], iteration_bounds = array<i64: 1>, scalar_prefetch = 0 : i64, scratch_operands = 0 : i64, tpu.core_type = #tpu.core_type<tc>, window_params = [{transform_indices = @transform_0, window_bounds = array<i64: 3, 8>}, {pipeline_mode = #tpu.pipeline_mode<synchronous>, transform_indices = @transform_1, window_bounds = array<i64: 8, 3>}, {pipeline_mode = #tpu.pipeline_mode<synchronous>, transform_indices = @transform_2, window_bounds = array<i64: 8, 1>}, {transform_indices = @transform_3, window_bounds = array<i64: 8, 8>}]} {
    %c0 = arith.constant 0 : index
    %c0_0 = arith.constant 0 : index
    %0 = vector.load %arg1[%c0, %c0_0] : memref<3x8xf32, #tpu.memory_space<vmem>>, vector<3x8xf32>
    %c0_1 = arith.constant 0 : index
    %c0_2 = arith.constant 0 : index
    %1 = vector.load %arg2[%c0_1, %c0_2] : memref<8x3xf32, #tpu.memory_space<vmem>>, vector<8x3xf32>
    %c0_3 = arith.constant 0 : index
    %c0_4 = arith.constant 0 : index
    %2 = vector.load %arg3[%c0_3, %c0_4] : memref<8x1xf32, #tpu.memory_space<vmem>>, vector<8x1xf32>
    %3 = vector.extract_strided_slice %1 {offsets = [0, 0], sizes = [8, 1], strides = [1, 1]} : vector<8x3xf32> to vector<8x1xf32>
    %4 = vector.extract_strided_slice %0 {offsets = [0, 0], sizes = [1, 8], strides = [1, 1]} : vector<3x8xf32> to vector<1x8xf32>
    %5 = vector.broadcast %3 : vector<8x1xf32> to vector<8x8xf32>
    %6 = vector.broadcast %4 : vector<1x8xf32> to vector<8x8xf32>
    %7 = arith.mulf %5, %6 : vector<8x8xf32>
    %8 = vector.extract_strided_slice %1 {offsets = [0, 1], sizes = [8, 1], strides = [1, 1]} : vector<8x3xf32> to vector<8x1xf32>
    %9 = vector.extract_strided_slice %0 {offsets = [1, 0], sizes = [1, 8], strides = [1, 1]} : vector<3x8xf32> to vector<1x8xf32>
    %10 = vector.broadcast %8 : vector<8x1xf32> to vector<8x8xf32>
    %11 = vector.broadcast %9 : vector<1x8xf32> to vector<8x8xf32>
    %12 = arith.mulf %10, %11 : vector<8x8xf32>
    %13 = arith.addf %7, %12 : vector<8x8xf32>
    %14 = vector.extract_strided_slice %1 {offsets = [0, 2], sizes = [8, 1], strides = [1, 1]} : vector<8x3xf32> to vector<8x1xf32>
    %15 = vector.extract_strided_slice %0 {offsets = [2, 0], sizes = [1, 8], strides = [1, 1]} : vector<3x8xf32> to vector<1x8xf32>
    %16 = vector.broadcast %14 : vector<8x1xf32> to vector<8x8xf32>
    %17 = vector.broadcast %15 : vector<1x8xf32> to vector<8x8xf32>
    %18 = arith.mulf %16, %17 : vector<8x8xf32>
    %19 = arith.addf %13, %18 : vector<8x8xf32>
    %20 = vector.broadcast %2 : vector<8x1xf32> to vector<8x8xf32>
    %21 = arith.addf %19, %20 : vector<8x8xf32>
    %c0_5 = arith.constant 0 : index
    %c0_6 = arith.constant 0 : index
    %22 = vector.load %arg4[%c0_5, %c0_6] : memref<8x8xf32, #tpu.memory_space<vmem>>, vector<8x8xf32>
    tpu.vector_store %arg4[%c0_5, %c0_6], %21 {strides = array<i32>} : memref<8x8xf32, #tpu.memory_space<vmem>>, vector<8x8xf32>,
    return
  }
  func.func @transform_0(%arg0: i32) -> (i32, i32) {
    %c0_i32 = arith.constant 0 : i32
    %c0_i32_0 = arith.constant 0 : i32
    return %c0_i32, %arg0 : i32, i32
  }
  func.func @transform_1(%arg0: i32) -> (i32, i32) {
    %c0_i32 = arith.constant 0 : i32
    %c0_i32_0 = arith.constant 0 : i32
    %c0_i32_1 = arith.constant 0 : i32
    return %c0_i32, %c0_i32_0 : i32, i32
  }
  func.func @transform_2(%arg0: i32) -> (i32, i32) {
    %c0_i32 = arith.constant 0 : i32
    %c0_i32_0 = arith.constant 0 : i32
    %c0_i32_1 = arith.constant 0 : i32
    return %c0_i32, %c0_i32_0 : i32, i32
  }
  func.func @transform_3(%arg0: i32) -> (i32, i32) {
    %c0_i32 = arith.constant 0 : i32
    %c0_i32_0 = arith.constant 0 : i32
    return %c0_i32, %arg0 : i32, i32
  }
}

</mosaic_0001>

<bundles_post_ra>
// kernel: multihead_forward.1
= control target key start
LH: loop header
LB: loop body
LE: loop exit
PB: predicated region body
PF: predicated region fallthrough
CT: control target
= control target key end

     0   :  { %v67_v0 = vmov 0   ;;  %v68_v2 = vmov 2   ;;  %v69_v4 = vmov 1   ;;  %v22_v5 = vlaneseq  ;;  %s102_s1 = inlined_call_operand.vmem [shape: f32[8,3], index: 1, kind: input, shape index: {}]   ;;  %s103_s2 = inlined_call_operand.vmem [shape: f32[8,1], index: 2, kind: input, shape index: {}]   ;;  %s104_s0 = inlined_call_operand.vmem [shape: f32[3,8], index: 0, kind: input, shape index: {}]   ;;  %s105_s3 = inlined_call_operand.vmem [shape: f32[8,8], index: 3, kind: output, shape index: {}]  }
   0x1   :  { %62 = vset.pattern.permute.xlu0 %v67_v0  ;;  %v15_v1 = vld [vmem:[%s102_s1] sm:$0xff]  ;;  %64 = vset.pattern.permute.xlu1 %v68_v2  ;;  %vm53_vm0 = vcmask 64512  }
   0x2   :  { %19 = vperm.xlu0 %62, %v15_v1   ;;  %38 = vperm.xlu1 %64, %v15_v1   ;;  %v16_v3 = vld [vmem:[%s103_s2] sm:$0xff]  ;;  %v23_v6 = vshrl.u32 %v22_v5, 7 }
   0x3   :  { %v14_v10 = vld [vmem:[%s104_s0] sm:$0x7] }
   0x4   :  { %v24_v7 = vsub.s32 0, %v23_v6  ;;  %v33_v8 = vsub.s32 1, %v23_v6  ;;  %v43_v9 = vsub.s32 2, %v23_v6 }
   0x6   :  { %63 = vset.pattern.permute.xlu0 %v69_v4  ;;  %65 = vset.pattern.permute.xlu1 %v67_v0  ;;  %v25_v12 = vrot.slane %v14_v10, %v24_v7  ;;  %v34_v13 = vrot.slane %v14_v10, %v33_v8  ;;  %v44_v14 = vrot.slane %v14_v10, %v43_v9 }
   0x7   :  { %28 = vperm.xlu0 %63, %v15_v1   ;;  %49 = vperm.xlu1 %65, %v16_v3  }
   0xb   :  { %66 = vset.pattern.permute.xlu0 %v67_v0 }
  0x81   :  { %v20_v11 = vpop.permute.xlu0 %19  ;;  %v39_v15 = vpop.permute.xlu1 %38 }
  0x82   :  { %v26_v17 = vmul.f32 %v25_v12, %v20_v11  ;;  %v45_v19 = vmul.f32 %v44_v14, %v39_v15 }
  0x86   :  { %v29_v16 = vpop.permute.xlu0 %28  ;;  %v50_v21 = vpop.permute.xlu1 %49 }
  0x87   :  { %v35_v18 = vmul.f32 %v34_v13, %v29_v16 }
  0x89   :  { %v36_v20 = vadd.f32 %v35_v18, %v26_v17 }
  0x8b   :  { %v46_v22 = vadd.f32 %v45_v19, %v36_v20 }
  0x8d   :  { %v52_v23 = vadd.f32 %v50_v21, %v46_v22 }
  0x8f   :  { %54 = vst.msk [vmem:[%s105_s3] sm:$0xff] %vm53_vm0, %v52_v23 }

</bundles_post_ra>
